<compile_context>
chip_gen: v6e
topology: v6e:2x2x1
jax: 0.10.0
libtpu: 0.0.40
codegen_flags: <defaults>
</compile_context>

<pallas_src>
import functools
import math

import jax
import jax.numpy as jnp
from jax.experimental import pallas as pl
from jax.experimental.pallas import tpu as pltpu


def _round_up(n, m):
    return ((n + m - 1) // m) * m


def _vmem_capacity_bytes():
    """Best-effort per-core VMEM capacity query (fallback: 64 MiB, v7x floor)."""
    try:
        cap = getattr(pltpu.get_tpu_info(), "vmem_capacity_bytes", None)
        if cap:
            return int(cap)
    except Exception:
        pass
    return 64 << 20


def gru_seq_kernel(h0_ref, xs_ref, wi_ref, bi_ref, wh_ref, bh_ref,
                   out_ref, h_scr, *, hp):
    """GRU steps for one batch tile; h carried in VMEM scratch over the
    trailing ("arbitrary") time grid axis.

      h0_ref : (Bt, Hp)     f32          initial hidden state (read at t == 0)
      xs_ref : (1, Bt, Ip)  weight dtype this step's input tile
      wi_ref : (Ip, 3*Hp)   weight dtype gate-major input->hidden  [r | z | n]
      bi_ref : (1, 3*Hp)    f32
      wh_ref : (Hp, 3*Hp)   weight dtype gate-major hidden->hidden [r | z | n]
      bh_ref : (1, 3*Hp)    f32
      out_ref: (1, Bt, Hp)  f32          hidden state after this step
      h_scr  : (Bt, Hp)     f32          VMEM scratch carrying h across steps
    """
    t = pl.program_id(1)

    @pl.when(t == 0)
    def _():
        h_scr[...] = h0_ref[...]

    h = h_scr[...]                               # f32 recurrent state
    x = xs_ref[0]                                # (Bt, Ip)

    # Two fused MXU passes per step (all three gates stacked along N);
    # low-precision operands, f32 accumulation, gate math in f32.
    gi = jnp.dot(x, wi_ref[...], preferred_element_type=jnp.float32) + bi_ref[...]
    gh = jnp.dot(h.astype(wh_ref.dtype), wh_ref[...],
                 preferred_element_type=jnp.float32) + bh_ref[...]

    r = jax.nn.sigmoid(gi[:, :hp] + gh[:, :hp])                       # reset
    z = jax.nn.sigmoid(gi[:, hp:2 * hp] + gh[:, hp:2 * hp])           # update
    n = jnp.tanh(gi[:, 2 * hp:] + r * gh[:, 2 * hp:])                 # new

    h_new = n + z * (h - n)                      # hidden_updated (module spec)
    h_scr[...] = h_new
    out_ref[0] = h_new.astype(out_ref.dtype)


def prepare_gru_params(w_ih, b_ih, w_hh, b_hh, *, weight_dtype=jnp.bfloat16):
    """One-time preprocessing of PyTorch-layout GRUCell parameters.

    w_ih: (3H, I), w_hh: (3H, H), b_*: (3H,), gate order [reset, update, new].
    Returns gate-major, pre-transposed, lane-padded slabs with all three gates
    fused along the output (N) axis, weights cast to `weight_dtype`.
    """
    three_h, I = w_ih.shape
    H = three_h // 3
    assert w_hh.shape == (3 * H, H) and b_ih.shape == (3 * H,) and b_hh.shape == (3 * H,)

    Ip = _round_up(I, 128)
    Hp = _round_up(H, 128)

    # (3H, K) -> (3, K, H): gate-major, transposed so matmuls are row-major.
    wi = w_ih.reshape(3, H, I).transpose(0, 2, 1)                   # (3, I, H)
    wh = w_hh.reshape(3, H, H).transpose(0, 2, 1)                   # (3, H, H)
    bi = b_ih.reshape(3, 1, H)
    bh = b_hh.reshape(3, 1, H)

    # Pad each gate slab to lane-aligned (Kp, Hp), then lay gates out along N:
    # one fused (Kp, 3*Hp) matmul per operand, gate slices at Hp multiples.
    wi_p = jnp.pad(wi, ((0, 0), (0, Ip - I), (0, Hp - H)))          # (3, Ip, Hp)
    wh_p = jnp.pad(wh, ((0, 0), (0, Hp - H), (0, Hp - H)))          # (3, Hp, Hp)
    bi_p = jnp.pad(bi, ((0, 0), (0, 0), (0, Hp - H)))               # (3, 1, Hp)
    bh_p = jnp.pad(bh, ((0, 0), (0, 0), (0, Hp - H)))               # (3, 1, Hp)

    wi_f = wi_p.transpose(1, 0, 2).reshape(Ip, 3 * Hp).astype(weight_dtype)
    wh_f = wh_p.transpose(1, 0, 2).reshape(Hp, 3 * Hp).astype(weight_dtype)
    bi_f = bi_p.transpose(1, 0, 2).reshape(1, 3 * Hp).astype(jnp.float32)
    bh_f = bh_p.transpose(1, 0, 2).reshape(1, 3 * Hp).astype(jnp.float32)

    return {"wi": wi_f, "bi": bi_f, "wh": wh_f, "bh": bh_f,
            "I": I, "H": H, "Ip": Ip, "Hp": Hp}


def _pick_batch_tile(B, max_tile=256):
    """Big batch tiles (MXU M-dim utilization, fewer grid steps), but keep
    >= 2 parallel grid iterations when the batch allows (v7x megacore)."""
    bp8 = _round_up(B, 8)
    bt = min(bp8, max_tile)
    if bp8 // bt < 2 and bp8 >= 16:
        bt = _round_up(bp8 // 2, 8)
    return bt


def gru_sequence_forward(xs, h0, params, *, batch_tile=None):
    """xs: (T, B, I), h0: (B, H) -> all hidden states (T, B, H).

    The whole sequence runs inside ONE pallas_call: weights stay resident in
    VMEM, h is carried in VMEM scratch across the sequential time axis.
    """
    T, B, I = xs.shape
    H = h0.shape[1]
    assert I == params["I"] and H == params["H"] and h0.shape == (B, H)
    Ip, Hp = params["Ip"], params["Hp"]
    wdt = params["wi"].dtype

    Bt = batch_tile if batch_tile is not None else _pick_batch_tile(B)
    Bp = _round_up(B, Bt)
    nb = Bp // Bt

    # Pad once per sequence call (not per step); activations streamed in the
    # weight dtype so the per-step activation DMA bytes are halved for bf16.
    xs_p = jnp.zeros((T, Bp, Ip), wdt).at[:, :B, :I].set(xs.astype(wdt))
    h0_p = jnp.zeros((Bp, Hp), jnp.float32).at[:B, :H].set(h0.astype(jnp.float32))

    kernel = functools.partial(gru_seq_kernel, hp=Hp)
    grid = (nb, T)

    # Advisory cost estimate for the fused layout.
    w_itemsize = jnp.dtype(wdt).itemsize
    w_bytes = (params["wi"].size + params["wh"].size) * w_itemsize \
        + (params["bi"].size + params["bh"].size) * 4
    flops = 2 * T * Bp * (Ip + Hp) * 3 * Hp
    act_bytes = xs_p.size * w_itemsize + h0_p.size * 4 + T * Bp * Hp * 4
    cost = pl.CostEstimate(flops=int(flops),
                           transcendentals=int(3 * T * Bp * Hp),
                           bytes_accessed=int(w_bytes * nb + act_bytes))

    # VMEM: resident weights (+ double-buffered streamed tiles + headroom),
    # clamped to the chip's real capacity (v7x only has 64 MiB per core).
    tile_bytes = Bt * Ip * w_itemsize + 3 * Bt * Hp * 4 + 2 * Bt * 3 * Hp * 4
    need = 2 * w_bytes + 4 * tile_bytes + (8 << 20)
    vmem_limit = int(min(max(32 << 20, need), _vmem_capacity_bytes() - (2 << 20)))

    out_p = pl.pallas_call(
        kernel,
        out_shape=jax.ShapeDtypeStruct((T, Bp, Hp), jnp.float32),
        grid=grid,
        in_specs=[
            pl.BlockSpec((Bt, Hp), lambda b, t: (b, 0)),          # h0 per batch tile
            pl.BlockSpec((1, Bt, Ip), lambda b, t: (t, b, 0)),    # x_t streamed
            pl.BlockSpec((Ip, 3 * Hp), lambda b, t: (0, 0)),      # resident weights
            pl.BlockSpec((1, 3 * Hp), lambda b, t: (0, 0)),
            pl.BlockSpec((Hp, 3 * Hp), lambda b, t: (0, 0)),
            pl.BlockSpec((1, 3 * Hp), lambda b, t: (0, 0)),
        ],
        out_specs=pl.BlockSpec((1, Bt, Hp), lambda b, t: (t, b, 0)),
        scratch_shapes=[pltpu.VMEM((Bt, Hp), jnp.float32)],
        compiler_params=pltpu.CompilerParams(
            dimension_semantics=("parallel", "arbitrary"),
            vmem_limit_bytes=vmem_limit,
        ),
        cost_estimate=cost,
    )(h0_p, xs_p, params["wi"], params["bi"], params["wh"], params["bh"])

    return out_p[:, :B, :H]


def gru_cell_forward(x, h, params, *, batch_tile=None):
    """Single GRUCell step (the module's forward): x (B, I), h (B, H) -> (B, H)."""
    return gru_sequence_forward(x[None], h, params, batch_tile=batch_tile)[0]


def reference_gru_cell(x, h, w_ih, b_ih, w_hh, b_hh):
    H = h.shape[1]
    gi = x @ w_ih.T + b_ih
    gh = h @ w_hh.T + b_hh
    gi_r, gi_z, gi_n = gi[:, :H], gi[:, H:2 * H], gi[:, 2 * H:]
    gh_r, gh_z, gh_n = gh[:, :H], gh[:, H:2 * H], gh[:, 2 * H:]
    r = jax.nn.sigmoid(gi_r + gh_r)
    z = jax.nn.sigmoid(gi_z + gh_z)
    n = jnp.tanh(gi_n + r * gh_n)
    return n + z * (h - n)


if __name__ == "__main__":
    batch = 8
    input_size = 16
    hidden_size = 32
    seq_len = 6

    key = jax.random.PRNGKey(0)
    kx, kxs, kh, k1, k2, k3, k4 = jax.random.split(key, 7)

    x = jax.random.normal(kx, (batch, input_size), dtype=jnp.float32)
    xs = jax.random.normal(kxs, (seq_len, batch, input_size), dtype=jnp.float32)
    h = jax.random.normal(kh, (batch, hidden_size), dtype=jnp.float32)

    # Deterministic parameter init mirroring reset_premeters(): U(-std, std).
    std = 1.0 / math.sqrt(hidden_size)
    w_ih = jax.random.uniform(k1, (3 * hidden_size, input_size),
                              minval=-std, maxval=std, dtype=jnp.float32)
    b_ih = jax.random.uniform(k2, (3 * hidden_size,),
                              minval=-std, maxval=std, dtype=jnp.float32)
    w_hh = jax.random.uniform(k3, (3 * hidden_size, hidden_size),
                              minval=-std, maxval=std, dtype=jnp.float32)
    b_hh = jax.random.uniform(k4, (3 * hidden_size,),
                              minval=-std, maxval=std, dtype=jnp.float32)

    # --- strict structural check: f32 weights must match the reference tightly.
    params_f32 = jax.block_until_ready(
        prepare_gru_params(w_ih, b_ih, w_hh, b_hh, weight_dtype=jnp.float32))
    out_f32 = jax.block_until_ready(gru_cell_forward(x, h, params_f32))
    ref1 = reference_gru_cell(x, h, w_ih, b_ih, w_hh, b_hh)
    assert out_f32.shape == (batch, hidden_size)
    assert jnp.allclose(out_f32, ref1, atol=2e-5, rtol=1e-5), "f32 mismatch vs reference"

    # --- production path: bf16 weights/activations for the dots, f32 gate math.
    params = jax.block_until_ready(prepare_gru_params(w_ih, b_ih, w_hh, b_hh))
    out = jax.block_until_ready(gru_cell_forward(x, h, params))
    assert out.shape == (batch, hidden_size)
    assert jnp.allclose(out, ref1, atol=3e-2), "bf16 single-step mismatch vs reference"

    # --- recurrent path: whole sequence in one pallas_call, weights resident.
    hs = jax.block_until_ready(gru_sequence_forward(xs, h, params))
    h_ref = h
    hs_ref = []
    for t in range(seq_len):
        h_ref = reference_gru_cell(xs[t], h_ref, w_ih, b_ih, w_hh, b_hh)
        hs_ref.append(h_ref)
    hs_ref = jnp.stack(hs_ref)
    assert hs.shape == (seq_len, batch, hidden_size)
    assert jnp.allclose(hs, hs_ref, atol=6e-2), "bf16 sequence mismatch vs reference"

    print("KERNEL_OK")
</pallas_src>

<mosaic_0001>
module attributes {stable_mosaic.version = 11 : i64} {
  func.func @gru_seq_kernel(%arg0: i32, %arg1: i32, %arg2: memref<8x128xf32, #tpu.memory_space<vmem>>, %arg3: memref<1x8x128xf32, #tpu.memory_space<vmem>>, %arg4: memref<128x384xf32, #tpu.memory_space<vmem>>, %arg5: memref<1x384xf32, #tpu.memory_space<vmem>>, %arg6: memref<128x384xf32, #tpu.memory_space<vmem>>, %arg7: memref<1x384xf32, #tpu.memory_space<vmem>>, %arg8: memref<1x8x128xf32, #tpu.memory_space<vmem>>, %arg9: memref<8x128xf32, #tpu.memory_space<vmem>>) attributes {dimension_semantics = [#tpu.dimension_semantics<parallel>, #tpu.dimension_semantics<arbitrary>], iteration_bounds = array<i64: 1, 1>, scalar_prefetch = 0 : i64, scratch_operands = 1 : i64, tpu.core_type = #tpu.core_type<tc>, window_params = [{transform_indices = @transform_0, window_bounds = array<i64: 8, 128>}, {transform_indices = @transform_1, window_bounds = array<i64: 1, 8, 128>}, {pipeline_mode = #tpu.pipeline_mode<synchronous>, transform_indices = @transform_2, window_bounds = array<i64: 128, 384>}, {pipeline_mode = #tpu.pipeline_mode<synchronous>, transform_indices = @transform_3, window_bounds = array<i64: 1, 384>}, {pipeline_mode = #tpu.pipeline_mode<synchronous>, transform_indices = @transform_4, window_bounds = array<i64: 128, 384>}, {pipeline_mode = #tpu.pipeline_mode<synchronous>, transform_indices = @transform_5, window_bounds = array<i64: 1, 384>}, {transform_indices = @transform_6, window_bounds = array<i64: 1, 8, 128>}]} {
    %c0_i32 = arith.constant 0 : i32
    %0 = arith.cmpi eq, %arg1, %c0_i32 : i32
    %1 = arith.extui %0 : i1 to i32
    %c0_i32_0 = arith.constant 0 : i32
    %2 = arith.cmpi ne, %1, %c0_i32_0 : i32
    scf.if %2 {
      %c0_21 = arith.constant 0 : index
      %c0_22 = arith.constant 0 : index
      %44 = vector.load %arg2[%c0_21, %c0_22] : memref<8x128xf32, #tpu.memory_space<vmem>>, vector<8x128xf32>
      %c0_23 = arith.constant 0 : index
      %c0_24 = arith.constant 0 : index
      %45 = vector.load %arg9[%c0_23, %c0_24] : memref<8x128xf32, #tpu.memory_space<vmem>>, vector<8x128xf32>
      tpu.vector_store %arg9[%c0_23, %c0_24], %44 {strides = array<i32>} : memref<8x128xf32, #tpu.memory_space<vmem>>, vector<8x128xf32>,
    } else {
    }
    %c0 = arith.constant 0 : index
    %c0_1 = arith.constant 0 : index
    %3 = vector.load %arg9[%c0, %c0_1] : memref<8x128xf32, #tpu.memory_space<vmem>>, vector<8x128xf32>
    %c0_2 = arith.constant 0 : index
    %c0_3 = arith.constant 0 : index
    %c0_4 = arith.constant 0 : index
    %4 = vector.load %arg3[%c0_2, %c0_3, %c0_4] : memref<1x8x128xf32, #tpu.memory_space<vmem>>, vector<1x8x128xf32>
    %5 = vector.shape_cast %4 : vector<1x8x128xf32> to vector<8x128xf32>
    %c0_5 = arith.constant 0 : index
    %c0_6 = arith.constant 0 : index
    %6 = vector.load %arg4[%c0_5, %c0_6] : memref<128x384xf32, #tpu.memory_space<vmem>>, vector<128x384xf32>
    %cst = arith.constant dense<0.000000e+00> : vector<8x384xf32>
    %7 = tpu.matmul %5, %6, %cst {dimension_numbers = #tpu.dot_dimension_numbers<[1], [0], [0], [1], [0, 0, 1, 1], [], []>} : vector<8x128xf32>, vector<128x384xf32>, vector<8x384xf32> -> vector<8x384xf32>
    %c0_7 = arith.constant 0 : index
    %c0_8 = arith.constant 0 : index
    %8 = vector.load %arg5[%c0_7, %c0_8] : memref<1x384xf32, #tpu.memory_space<vmem>>, vector<1x384xf32>
    %9 = vector.broadcast %8 : vector<1x384xf32> to vector<8x384xf32>
    %10 = arith.addf %7, %9 : vector<8x384xf32>
    %c0_9 = arith.constant 0 : index
    %c0_10 = arith.constant 0 : index
    %11 = vector.load %arg6[%c0_9, %c0_10] : memref<128x384xf32, #tpu.memory_space<vmem>>, vector<128x384xf32>
    %cst_11 = arith.constant dense<0.000000e+00> : vector<8x384xf32>
    %12 = tpu.matmul %3, %11, %cst_11 {dimension_numbers = #tpu.dot_dimension_numbers<[1], [0], [0], [1], [0, 0, 1, 1], [], []>} : vector<8x128xf32>, vector<128x384xf32>, vector<8x384xf32> -> vector<8x384xf32>
    %c0_12 = arith.constant 0 : index
    %c0_13 = arith.constant 0 : index
    %13 = vector.load %arg7[%c0_12, %c0_13] : memref<1x384xf32, #tpu.memory_space<vmem>>, vector<1x384xf32>
    %14 = vector.broadcast %13 : vector<1x384xf32> to vector<8x384xf32>
    %15 = arith.addf %12, %14 : vector<8x384xf32>
    %16 = vector.extract_strided_slice %10 {offsets = [0, 0], sizes = [8, 128], strides = [1, 1]} : vector<8x384xf32> to vector<8x128xf32>
    %17 = vector.extract_strided_slice %15 {offsets = [0, 0], sizes = [8, 128], strides = [1, 1]} : vector<8x384xf32> to vector<8x128xf32>
    %18 = arith.addf %16, %17 : vector<8x128xf32>
    %19 = arith.negf %18 : vector<8x128xf32>
    %20 = math.exp %19 : vector<8x128xf32>
    %cst_14 = arith.constant 1.000000e+00 : f32
    %21 = vector.broadcast %cst_14 : f32 to vector<8x128xf32>
    %22 = arith.addf %21, %20 : vector<8x128xf32>
    %23 = arith.divf %21, %22 : vector<8x128xf32>
    %24 = vector.extract_strided_slice %10 {offsets = [0, 128], sizes = [8, 128], strides = [1, 1]} : vector<8x384xf32> to vector<8x128xf32>
    %25 = vector.extract_strided_slice %15 {offsets = [0, 128], sizes = [8, 128], strides = [1, 1]} : vector<8x384xf32> to vector<8x128xf32>
    %26 = arith.addf %24, %25 : vector<8x128xf32>
    %27 = arith.negf %26 : vector<8x128xf32>
    %28 = math.exp %27 : vector<8x128xf32>
    %cst_15 = arith.constant 1.000000e+00 : f32
    %29 = vector.broadcast %cst_15 : f32 to vector<8x128xf32>
    %30 = arith.addf %29, %28 : vector<8x128xf32>
    %31 = arith.divf %29, %30 : vector<8x128xf32>
    %32 = vector.extract_strided_slice %10 {offsets = [0, 256], sizes = [8, 128], strides = [1, 1]} : vector<8x384xf32> to vector<8x128xf32>
    %33 = vector.extract_strided_slice %15 {offsets = [0, 256], sizes = [8, 128], strides = [1, 1]} : vector<8x384xf32> to vector<8x128xf32>
    %34 = arith.mulf %23, %33 : vector<8x128xf32>
    %35 = arith.addf %32, %34 : vector<8x128xf32>
    %36 = math.tanh %35 : vector<8x128xf32>
    %37 = arith.subf %3, %36 : vector<8x128xf32>
    %38 = arith.mulf %31, %37 : vector<8x128xf32>
    %39 = arith.addf %36, %38 : vector<8x128xf32>
    %c0_16 = arith.constant 0 : index
    %c0_17 = arith.constant 0 : index
    %40 = vector.load %arg9[%c0_16, %c0_17] : memref<8x128xf32, #tpu.memory_space<vmem>>, vector<8x128xf32>
    tpu.vector_store %arg9[%c0_16, %c0_17], %39 {strides = array<i32>} : memref<8x128xf32, #tpu.memory_space<vmem>>, vector<8x128xf32>,
    %c0_18 = arith.constant 0 : index
    %c0_19 = arith.constant 0 : index
    %c0_20 = arith.constant 0 : index
    %41 = vector.load %arg8[%c0_18, %c0_19, %c0_20] : memref<1x8x128xf32, #tpu.memory_space<vmem>>, vector<1x8x128xf32>
    %42 = vector.shape_cast %41 : vector<1x8x128xf32> to vector<8x128xf32>
    %43 = vector.shape_cast %39 : vector<8x128xf32> to vector<1x8x128xf32>
    tpu.vector_store %arg8[%c0_18, %c0_19, %c0_20], %43 {strides = array<i32>} : memref<1x8x128xf32, #tpu.memory_space<vmem>>, vector<1x8x128xf32>,
    return
  }
  func.func @transform_0(%arg0: i32, %arg1: i32) -> (i32, i32) {
    %c0_i32 = arith.constant 0 : i32
    %c0_i32_0 = arith.constant 0 : i32
    return %arg0, %c0_i32 : i32, i32
  }
  func.func @transform_1(%arg0: i32, %arg1: i32) -> (i32, i32, i32) {
    %c0_i32 = arith.constant 0 : i32
    %c0_i32_0 = arith.constant 0 : i32
    return %arg1, %arg0, %c0_i32 : i32, i32, i32
  }
  func.func @transform_2(%arg0: i32, %arg1: i32) -> (i32, i32) {
    %c0_i32 = arith.constant 0 : i32
    %c0_i32_0 = arith.constant 0 : i32
    %c0_i32_1 = arith.constant 0 : i32
    return %c0_i32, %c0_i32_0 : i32, i32
  }
  func.func @transform_3(%arg0: i32, %arg1: i32) -> (i32, i32) {
    %c0_i32 = arith.constant 0 : i32
    %c0_i32_0 = arith.constant 0 : i32
    %c0_i32_1 = arith.constant 0 : i32
    return %c0_i32, %c0_i32_0 : i32, i32
  }
  func.func @transform_4(%arg0: i32, %arg1: i32) -> (i32, i32) {
    %c0_i32 = arith.constant 0 : i32
    %c0_i32_0 = arith.constant 0 : i32
    %c0_i32_1 = arith.constant 0 : i32
    return %c0_i32, %c0_i32_0 : i32, i32
  }
  func.func @transform_5(%arg0: i32, %arg1: i32) -> (i32, i32) {
    %c0_i32 = arith.constant 0 : i32
    %c0_i32_0 = arith.constant 0 : i32
    %c0_i32_1 = arith.constant 0 : i32
    return %c0_i32, %c0_i32_0 : i32, i32
  }
  func.func @transform_6(%arg0: i32, %arg1: i32) -> (i32, i32, i32) {
    %c0_i32 = arith.constant 0 : i32
    %c0_i32_0 = arith.constant 0 : i32
    return %arg1, %arg0, %c0_i32 : i32, i32, i32
  }
}

</mosaic_0001>

<bundles_post_ra>
// kernel: tpu_custom_call.1
= control target key start
LH: loop header
LB: loop body
LE: loop exit
PB: predicated region body
PF: predicated region fallthrough
CT: control target
= control target key end

     0   :  { %11 = vsyncpa [#allocation4], 0  ;;  %s875_s0 = inlined_call_operand.hbm [shape: f32[8,128], index: 0, kind: input, shape index: {}]   ;;  %s876_s1 = inlined_call_operand.hbm [shape: f32[1,8,128], index: 1, kind: input, shape index: {}]   ;;  %s877_s2 = inlined_call_operand.hbm [shape: f32[128,384], index: 2, kind: input, shape index: {}]   ;;  %s878_s3 = inlined_call_operand.vmem [shape: f32[1,384], index: 3, kind: input, shape index: {}]   ;;  %s879_s4 = inlined_call_operand.hbm [shape: f32[128,384], index: 4, kind: input, shape index: {}]   ;;  %s880_s5 = inlined_call_operand.vmem [shape: f32[1,384], index: 5, kind: input, shape index: {}]   ;;  %s881_s6 = inlined_call_operand.hbm [shape: f32[1,8,128], index: 6, kind: output, shape index: {}]  }
   0x1   :  { %12 = vsyncpa [#allocation7], 0 }
   0x2   :  { %13 = vsyncpa [#allocation10], 0 }
   0x3   :  { %14 = vsyncpa [#allocation5], 0  ;;  %s767_s21 = smov [#allocation6]   ;;  %s768_s23 = smov [#allocation3]  }
   0x4   :  { %s31_s22 = sshll.u32 %s767_s21, 4  ;;  %s21_s24 = sshll.u32 %s768_s23, 4  ;;  %s32_s22 = int_to_ptr.vmem [resolvable:$true] %s31_s22  ;;  %s22_s24 = int_to_ptr.vmem [resolvable:$true] %s21_s24 }
   0x5   :  { %s667_s25 = scalar_lea.vmem %s32_s22, 128  ;;  %p672_p1 = scmp.lt.s32.totalorder %s32_s22, %s32_s22 }
   0x6   :  { %p668_p0 = scmp.ne.s32.totalorder %s32_s22, %s667_s25  ;;  %p673_p2 = scmp.lt.s32.totalorder %s667_s25, %s667_s25 }
   0x8   :  { %p674_p3 = por %p673_p2, %p672_p1 }
   0xa   :  { %p675_p4 = pnand %p674_p3, %p668_p0 }
   0xc   :  { %678 = shalt.err (!%p675_p4)
}
   0xd   :  { %34 = dma.hbm_to_vmem [thread:$0]  %s876_s1, 128, %s32_s22, [#allocation7]  }
   0xe   :  { %s687_s28 = scalar_lea.vmem %s22_s24, 128  ;;  %p692_p6 = scmp.lt.s32.totalorder %s22_s24, %s22_s24 }
   0xf   :  { %p688_p5 = scmp.ne.s32.totalorder %s22_s24, %s687_s28  ;;  %p693_p7 = scmp.lt.s32.totalorder %s687_s28, %s687_s28 }
  0x11   :  { %p694_p8 = por %p693_p7, %p692_p6 }
  0x13   :  { %p695_p9 = pnand %p694_p8, %p688_p5 }
  0x15   :  { %698 = shalt.err (!%p695_p9)
}
  0x16   :  { %24 = dma.hbm_to_vmem [thread:$0]  %s875_s0, 128, %s22_s24, [#allocation4]  }
  0x17   :  { %s769_s7 = smov [#allocation8]  }
  0x18   :  { %s40_s8 = sshll.u32 %s769_s7, 4  ;;  %s41_s8 = int_to_ptr.vmem [resolvable:$true] %s40_s8 }
  0x19   :  { %s707_s9 = scalar_lea.vmem %s41_s8, 6144  ;;  %p712_p11 = scmp.lt.s32.totalorder %s41_s8, %s41_s8 }
  0x1a   :  { %p708_p10 = scmp.ne.s32.totalorder %s41_s8, %s707_s9  ;;  %p713_p12 = scmp.lt.s32.totalorder %s707_s9, %s707_s9 }
  0x1c   :  { %p714_p13 = por %p713_p12, %p712_p11 }
  0x1e   :  { %p715_p0 = pnand %p714_p13, %p708_p10 }
  0x20   :  { %718 = shalt.err (!%p715_p0)
}
  0x21   :  { %s770_s1 = smov 384   ;;  %s771_s10 = smov 24  }
  0x22   :  { %46 = dma.hbm_to_vmem [thread:$0]  %s877_s2, 6144, %s41_s8, [#allocation7], %s770_s1, %s770_s1, %s771_s10  }
  0x23   :  { %s772_s13 = smov [#allocation9]  }
  0x24   :  { %s54_s14 = sshll.u32 %s772_s13, 4  ;;  %s55_s14 = int_to_ptr.vmem [resolvable:$true] %s54_s14 }
  0x25   :  { %s727_s0 = scalar_lea.vmem %s55_s14, 6144  ;;  %p732_p2 = scmp.lt.s32.totalorder %s55_s14, %s55_s14 }
  0x26   :  { %p728_p1 = scmp.ne.s32.totalorder %s55_s14, %s727_s0  ;;  %p733_p3 = scmp.lt.s32.totalorder %s727_s0, %s727_s0 }
  0x28   :  { %p734_p4 = por %p733_p3, %p732_p2 }
  0x2a   :  { %p735_p5 = pnand %p734_p4, %p728_p1 }
  0x2c   :  { %738 = shalt.err (!%p735_p5)
}
  0x2d   :  { %60 = dma.hbm_to_vmem [thread:$0]  %s879_s4, 6144, %s55_s14, [#allocation10], %s770_s1, %s770_s1, %s771_s10  }
  0x2e   :  { %759 = dma.done.wait [#allocation4], 128  }
  0x2f   :  { %760 = vsyncadd [#allocation4], 4294967168 }
  0x30   :  { %761 = dma.done.wait [#allocation7], 6272  }
  0x31   :  { %762 = vsyncadd [#allocation7], 4294961024 }
  0x32   :  { %763 = dma.done.wait [#allocation10], 6144  }
  0x33   :  { %764 = vsyncadd [#allocation10], 4294961152  ;;  %v773_v0 = vmov 0.0   ;;  %vm774_vm0 = vmmov 0   ;;  %v129_v1 = vld [vmem:[#allocation8 + $0x170] sm:$0xff]  ;;  %v128_v2 = vld [vmem:[#allocation8 + $0x168] sm:$0xff] }
  0x34   :  { %212 = vmatprep.mubr.f32.mxu0 %v773_v0  ;;  %570 = vmatprep.subr.mxu1 %v773_v0  ;;  %v126_v3 = vld [vmem:[#allocation8 + $0x158] sm:$0xff]  ;;  %v125_v4 = vld [vmem:[#allocation8 + $0x150] sm:$0xff]  ;;  %v123_v5 = vld [vmem:[#allocation8 + $0x140] sm:$0xff] }
  0x35   :  { %602 = vmatprep.mubr.msk.f32.mxu1 %vm774_vm0, %v773_v0  ;;  %148 = vmatprep.subr.mxu0 %v129_v1  ;;  %v122_v6 = vld [vmem:[#allocation8 + $0x138] sm:$0xff]  ;;  %v120_v7 = vld [vmem:[#allocation8 + $0x128] sm:$0xff]  ;;  %v119_v8 = vld [vmem:[#allocation8 + $0x120] sm:$0xff] }
  0x36   :  { %149 = vmatpush1.msra.mxu0 %v128_v2  ;;  %v117_v9 = vld [vmem:[#allocation8 + $0x110] sm:$0xff]  ;;  %v116_v10 = vld [vmem:[#allocation8 + $0x108] sm:$0xff]  ;;  %v114_v11 = vld [vmem:[#allocation8 + $0xf8] sm:$0xff] }
  0x37   :  { %150 = vmatprep.subr.mxu0 %v126_v3  ;;  %v113_v12 = vld [vmem:[#allocation8 + $0xf0] sm:$0xff]  ;;  %v111_v13 = vld [vmem:[#allocation8 + $0xe0] sm:$0xff]  ;;  %v110_v14 = vld [vmem:[#allocation8 + $0xd8] sm:$0xff] }
  0x38   :  { %151 = vmatpush1.msra.mxu0 %v125_v4  ;;  %v130_v15 = vld [vmem:[#allocation8 + $0x178] sm:$0xff]  ;;  %v108_v16 = vld [vmem:[#allocation8 + $0xc8] sm:$0xff]  ;;  %v127_v17 = vld [vmem:[#allocation8 + $0x160] sm:$0xff] }
  0x39   :  { %152 = vmatprep.subr.mxu0 %v123_v5  ;;  %571 = vmatpush3.msra.mxu1 %v130_v15  ;;  %v107_v18 = vld [vmem:[#allocation8 + $0xc0] sm:$0xff]  ;;  %v124_v19 = vld [vmem:[#allocation8 + $0x148] sm:$0xff]  ;;  %v105_v20 = vld [vmem:[#allocation8 + $0xb0] sm:$0xff] }
  0x3a   :  { %153 = vmatpush1.msra.mxu0 %v122_v6  ;;  %572 = vmatprep.subr.mxu1 %v773_v0  ;;  %v104_v21 = vld [vmem:[#allocation8 + $0xa8] sm:$0xff]  ;;  %v121_v22 = vld [vmem:[#allocation8 + $0x130] sm:$0xff]  ;;  %v102_v23 = vld [vmem:[#allocation8 + $0x98] sm:$0xff] }
  0x3b   :  { %154 = vmatprep.subr.mxu0 %v120_v7  ;;  %573 = vmatpush3.msra.mxu1 %v127_v17  ;;  %v101_v24 = vld [vmem:[#allocation8 + $0x90] sm:$0xff]  ;;  %v118_v25 = vld [vmem:[#allocation8 + $0x118] sm:$0xff]  ;;  %v99_v26 = vld [vmem:[#allocation8 + $0x80] sm:$0xff] }
  0x3c   :  { %155 = vmatpush1.msra.mxu0 %v119_v8  ;;  %574 = vmatprep.subr.mxu1 %v773_v0  ;;  %v98_v27 = vld [vmem:[#allocation8 + $0x78] sm:$0xff]  ;;  %v115_v28 = vld [vmem:[#allocation8 + $0x100] sm:$0xff]  ;;  %v96_v29 = vld [vmem:[#allocation8 + $0x68] sm:$0xff] }
  0x3d   :  { %156 = vmatprep.subr.mxu0 %v117_v9  ;;  %575 = vmatpush3.msra.mxu1 %v124_v19  ;;  %v95_v30 = vld [vmem:[#allocation8 + $0x60] sm:$0xff]  ;;  %v112_v31 = vld [vmem:[#allocation8 + $0xe8] sm:$0xff]  ;;  %v93_v32 = vld [vmem:[#allocation8 + $0x50] sm:$0xff] }
  0x3e   :  { %157 = vmatpush1.msra.mxu0 %v116_v10  ;;  %576 = vmatprep.subr.mxu1 %v773_v0  ;;  %v92_v33 = vld [vmem:[#allocation8 + $0x48] sm:$0xff]  ;;  %v109_v34 = vld [vmem:[#allocation8 + $0xd0] sm:$0xff]  ;;  %v90_v35 = vld [vmem:[#allocation8 + $0x38] sm:$0xff] }
  0x3f   :  { %158 = vmatprep.subr.mxu0 %v114_v11  ;;  %577 = vmatpush3.msra.mxu1 %v121_v22  ;;  %v89_v36 = vld [vmem:[#allocation8 + $0x30] sm:$0xff]  ;;  %v106_v37 = vld [vmem:[#allocation8 + $0xb8] sm:$0xff]  ;;  %v87_v38 = vld [vmem:[#allocation8 + $0x20] sm:$0xff] }
  0x40   :  { %159 = vmatpush1.msra.mxu0 %v113_v12  ;;  %578 = vmatprep.subr.mxu1 %v773_v0  ;;  %v86_v39 = vld [vmem:[#allocation8 + $0x18] sm:$0xff]  ;;  %v103_v40 = vld [vmem:[#allocation8 + $0xa0] sm:$0xff]  ;;  %v84_v41 = vld [vmem:[#allocation8 + $0x8] sm:$0xff] }
  0x41   :  { %160 = vmatprep.subr.mxu0 %v111_v13  ;;  %579 = vmatpush3.msra.mxu1 %v118_v25  ;;  %v83_v42 = vld [vmem:[#allocation8] sm:$0xff]  ;;  %v100_v43 = vld [vmem:[#allocation8 + $0x88] sm:$0xff]  ;;  %v82_v44 = vld [vmem:[#allocation6] sm:$0xff] }
  0x42   :  { %161 = vmatpush1.msra.mxu0 %v110_v14  ;;  %580 = vmatprep.subr.mxu1 %v773_v0  ;;  %v335_v45 = vld [vmem:[#allocation9 + $0x170] sm:$0xff]  ;;  %v334_v46 = vld [vmem:[#allocation9 + $0x168] sm:$0xff]  ;;  %v332_v47 = vld [vmem:[#allocation9 + $0x158] sm:$0xff] }
  0x43   :  { %162 = vmatprep.subr.mxu0 %v108_v16  ;;  %581 = vmatpush3.msra.mxu1 %v115_v28  ;;  %v97_v48 = vld [vmem:[#allocation8 + $0x70] sm:$0xff]  ;;  %v329_v50 = vld [vmem:[#allocation9 + $0x140] sm:$0xff]  ;;  %v94_v51 = vld [vmem:[#allocation8 + $0x58] sm:$0xff] }
  0x44   :  { %163 = vmatpush1.msra.mxu0 %v107_v18  ;;  %582 = vmatprep.subr.mxu1 %v773_v0  ;;  %v331_v49 = vld [vmem:[#allocation9 + $0x150] sm:$0xff]  ;;  %v328_v52 = vld [vmem:[#allocation9 + $0x138] sm:$0xff]  ;;  %v326_v53 = vld [vmem:[#allocation9 + $0x128] sm:$0xff] }
  0x45   :  { %164 = vmatprep.subr.mxu0 %v105_v20  ;;  %583 = vmatpush3.msra.mxu1 %v112_v31  ;;  %v91_v54 = vld [vmem:[#allocation8 + $0x40] sm:$0xff]  ;;  %v323_v56 = vld [vmem:[#allocation9 + $0x110] sm:$0xff]  ;;  %v88_v57 = vld [vmem:[#allocation8 + $0x28] sm:$0xff] }
  0x46   :  { %165 = vmatpush1.msra.mxu0 %v104_v21  ;;  %584 = vmatprep.subr.mxu1 %v773_v0  ;;  %v325_v55 = vld [vmem:[#allocation9 + $0x120] sm:$0xff]  ;;  %v322_v58 = vld [vmem:[#allocation9 + $0x108] sm:$0xff]  ;;  %v320_v59 = vld [vmem:[#allocation9 + $0xf8] sm:$0xff] }
  0x47   :  { %166 = vmatprep.subr.mxu0 %v102_v23  ;;  %585 = vmatpush3.msra.mxu1 %v109_v34  ;;  %v85_v60 = vld [vmem:[#allocation8 + $0x10] sm:$0xff]  ;;  %v317_v62 = vld [vmem:[#allocation9 + $0xe0] sm:$0xff]  ;;  %v316_v63 = vld [vmem:[#allocation9 + $0xd8] sm:$0xff] }
  0x48   :  { %167 = vmatpush1.msra.mxu0 %v101_v24  ;;  %586 = vmatprep.subr.mxu1 %v773_v0  ;;  %v319_v61 = vld [vmem:[#allocation9 + $0xf0] sm:$0xff]  ;;  %v314_v1 = vld [vmem:[#allocation9 + $0xc8] sm:$0xff]  ;;  %v336_v2 = vld [vmem:[#allocation9 + $0x178] sm:$0xff] }
  0x49   :  { %168 = vmatprep.subr.mxu0 %v99_v26  ;;  %587 = vmatpush3.msra.mxu1 %v106_v37  ;;  %v313_v3 = vld [vmem:[#allocation9 + $0xc0] sm:$0xff]  ;;  %v311_v4 = vld [vmem:[#allocation9 + $0xb0] sm:$0xff]  ;;  %v310_v6 = vld [vmem:[#allocation9 + $0xa8] sm:$0xff] }
  0x4a   :  { %169 = vmatpush1.msra.mxu0 %v98_v27  ;;  %588 = vmatprep.subr.mxu1 %v773_v0  ;;  %v333_v5 = vld [vmem:[#allocation9 + $0x160] sm:$0xff]  ;;  %v308_v7 = vld [vmem:[#allocation9 + $0x98] sm:$0xff]  ;;  %v330_v8 = vld [vmem:[#allocation9 + $0x148] sm:$0xff] }
  0x4b   :  { %170 = vmatprep.subr.mxu0 %v96_v29  ;;  %589 = vmatpush3.msra.mxu1 %v103_v40  ;;  %v307_v9 = vld [vmem:[#allocation9 + $0x90] sm:$0xff]  ;;  %v305_v10 = vld [vmem:[#allocation9 + $0x80] sm:$0xff]  ;;  %v304_v12 = vld [vmem:[#allocation9 + $0x78] sm:$0xff] }
  0x4c   :  { %171 = vmatpush1.msra.mxu0 %v95_v30  ;;  %590 = vmatprep.subr.mxu1 %v773_v0  ;;  %v327_v11 = vld [vmem:[#allocation9 + $0x130] sm:$0xff]  ;;  %v302_v13 = vld [vmem:[#allocation9 + $0x68] sm:$0xff]  ;;  %v324_v14 = vld [vmem:[#allocation9 + $0x118] sm:$0xff] }
  0x4d   :  { %172 = vmatprep.subr.mxu0 %v93_v32  ;;  %591 = vmatpush3.msra.mxu1 %v100_v43  ;;  %v301_v15 = vld [vmem:[#allocation9 + $0x60] sm:$0xff]  ;;  %v299_v16 = vld [vmem:[#allocation9 + $0x50] sm:$0xff]  ;;  %v298_v18 = vld [vmem:[#allocation9 + $0x48] sm:$0xff] }
  0x4e   :  { %173 = vmatpush1.msra.mxu0 %v92_v33  ;;  %592 = vmatprep.subr.mxu1 %v773_v0  ;;  %v321_v17 = vld [vmem:[#allocation9 + $0x100] sm:$0xff]  ;;  %v296_v19 = vld [vmem:[#allocation9 + $0x38] sm:$0xff]  ;;  %v318_v20 = vld [vmem:[#allocation9 + $0xe8] sm:$0xff] }
  0x4f   :  { %174 = vmatprep.subr.mxu0 %v90_v35  ;;  %593 = vmatpush3.msra.mxu1 %v97_v48  ;;  %v295_v21 = vld [vmem:[#allocation9 + $0x30] sm:$0xff]  ;;  %v293_v22 = vld [vmem:[#allocation9 + $0x20] sm:$0xff]  ;;  %v292_v24 = vld [vmem:[#allocation9 + $0x18] sm:$0xff] }
  0x50   :  { %175 = vmatpush1.msra.mxu0 %v89_v36  ;;  %594 = vmatprep.subr.mxu1 %v773_v0  ;;  %v315_v23 = vld [vmem:[#allocation9 + $0xd0] sm:$0xff]  ;;  %v290_v25 = vld [vmem:[#allocation9 + $0x8] sm:$0xff]  ;;  %v312_v26 = vld [vmem:[#allocation9 + $0xb8] sm:$0xff] }
  0x51   :  { %176 = vmatprep.subr.mxu0 %v87_v38  ;;  %595 = vmatpush3.msra.mxu1 %v94_v51  ;;  %v289_v27 = vld [vmem:[#allocation9] sm:$0xff]  ;;  %v851_v28 = vld [vmem:[#allocation3] sm:$0xff]  ;;  %v306_v30 = vld [vmem:[#allocation9 + $0x88] sm:$0xff]  ;;  %v133_v38 = vlaneseq }
  0x52   :  { %177 = vmatpush1.msra.mxu0 %v86_v39  ;;  %596 = vmatprep.subr.mxu1 %v773_v0  ;;  %v309_v29 = vld [vmem:[#allocation9 + $0xa0] sm:$0xff]  ;;  %v303_v31 = vld [vmem:[#allocation9 + $0x70] sm:$0xff]  ;;  %v300_v32 = vld [vmem:[#allocation9 + $0x58] sm:$0xff] }
  0x53   :  { %178 = vmatprep.subr.mxu0 %v84_v41  ;;  %597 = vmatpush3.msra.mxu1 %v91_v54  ;;  %v297_v33 = vld [vmem:[#allocation9 + $0x40] sm:$0xff]  ;;  %v294_v34 = vld [vmem:[#allocation9 + $0x28] sm:$0xff]  ;;  %v291_v35 = vld [vmem:[#allocation9 + $0x10] sm:$0xff]  ;;  %v134_v39 = vshrl.u32 %v133_v38, 7 }
  0x54   :  { %179 = vmatpush1.msra.mxu0 %v83_v42  ;;  %598 = vmatprep.subr.mxu1 %v773_v0  ;;  %v131_v41 = vld [vmem:[%s878_s3] sm:$0x7]  ;;  %s775_s3 = smov [#allocation11]  }
  0x55   :  { %213 = vmatmul.mubr.f32.vlgmr.msra.gmra.mxu0 %v82_v44  ;;  %354 = vmatprep.subr.mxu0 %v335_v45  ;;  %v135_v40 = vsub.s32 0, %v134_v39  ;;  %v337_v43 = vld [vmem:[%s880_s5] sm:$0x7]  ;;  %s523_s5 = sshll.u32 %s775_s3, 4  ;;  %s524_s5 = int_to_ptr.vmem [resolvable:$true] %s523_s5 }
  0x56   :  { %355 = vmatpush1.msra.mxu0 %v334_v46  ;;  %599 = vmatpush3.msra.mxu1 %v88_v57  ;;  %s739_s19 = scalar_lea.vmem %s524_s5, 128  ;;  %p744_p7 = scmp.lt.s32.totalorder %s524_s5, %s524_s5 }
  0x57   :  { %356 = vmatprep.subr.mxu0 %v332_v47  ;;  %600 = vmatprep.subr.mxu1 %v773_v0  ;;  %v342_v45 = vrot.slane %v337_v43, %v135_v40  ;;  %p740_p6 = scmp.ne.s32.totalorder %s524_s5, %s739_s19  ;;  %p745_p8 = scmp.lt.s32.totalorder %s739_s19, %s739_s19 }
  0x58   :  { %357 = vmatpush1.msra.mxu0 %v331_v49  ;;  %601 = vmatpush3.msra.mxu1 %v85_v60 }
  0x59   :  { %358 = vmatprep.subr.mxu0 %v329_v50  ;;  %418 = vmatprep.mubr.f32.mxu0 %v773_v0  ;;  %v139_v50 = vsub.s32 1, %v134_v39  ;;  %p746_p9 = por %p745_p8, %p744_p7 }
  0x5a   :  { %359 = vmatpush1.msra.mxu0 %v328_v52  ;;  %605 = vmatprep.subr.mxu1 %v773_v0 }
  0x5b   :  { %360 = vmatprep.subr.mxu0 %v326_v53  ;;  %603 = vmatmul.mubr.f32.vlgmr.msra.gmra.mxu1 %v82_v44  ;;  %v136_v44 = vrot.slane %v131_v41, %v135_v40  ;;  %v346_v52 = vrot.slane %v337_v43, %v139_v50  ;;  %v140_v54 = vrot.slane %v131_v41, %v139_v50  ;;  %p747_p10 = pnand %p746_p9, %p740_p6 }
  0x5c   :  { %361 = vmatpush1.msra.mxu0 %v325_v55  ;;  %606 = vmatpush3.msra.mxu1 %v336_v2 }
  0x5d   :  { %362 = vmatprep.subr.mxu0 %v323_v56  ;;  %607 = vmatprep.subr.mxu1 %v773_v0 }
  0x5e   :  { %363 = vmatpush1.msra.mxu0 %v322_v58  ;;  %608 = vmatpush3.msra.mxu1 %v333_v5 }
  0x5f   :  { %364 = vmatprep.subr.mxu0 %v320_v59  ;;  %609 = vmatprep.subr.mxu1 %v773_v0 }
  0x60   :  { %365 = vmatpush1.msra.mxu0 %v319_v61  ;;  %610 = vmatpush3.msra.mxu1 %v330_v8 }
  0x61   :  { %366 = vmatprep.subr.mxu0 %v317_v62  ;;  %611 = vmatprep.subr.mxu1 %v773_v0 }
  0x62   :  { %367 = vmatpush1.msra.mxu0 %v316_v63  ;;  %612 = vmatpush3.msra.mxu1 %v327_v11  ;;  %v143_v63 = vsub.s32 2, %v134_v39 }
  0x63   :  { %368 = vmatprep.subr.mxu0 %v314_v1  ;;  %613 = vmatprep.subr.mxu1 %v773_v0 }
  0x64   :  { %369 = vmatpush1.msra.mxu0 %v313_v3  ;;  %614 = vmatpush3.msra.mxu1 %v324_v14  ;;  %v350_v1 = vrot.slane %v337_v43, %v143_v63  ;;  %v144_v2 = vrot.slane %v131_v41, %v143_v63 }
  0x65   :  { %370 = vmatprep.subr.mxu0 %v311_v4  ;;  %615 = vmatprep.subr.mxu1 %v773_v0 }
  0x66   :  { %371 = vmatpush1.msra.mxu0 %v310_v6  ;;  %616 = vmatpush3.msra.mxu1 %v321_v17 }
  0x67   :  { %372 = vmatprep.subr.mxu0 %v308_v7  ;;  %617 = vmatprep.subr.mxu1 %v773_v0 }
  0x68   :  { %373 = vmatpush1.msra.mxu0 %v307_v9  ;;  %618 = vmatpush3.msra.mxu1 %v318_v20 }
  0x69   :  { %374 = vmatprep.subr.mxu0 %v305_v10  ;;  %619 = vmatprep.subr.mxu1 %v773_v0 }
  0x6a   :  { %375 = vmatpush1.msra.mxu0 %v304_v12  ;;  %620 = vmatpush3.msra.mxu1 %v315_v23 }
  0x6b   :  { %376 = vmatprep.subr.mxu0 %v302_v13  ;;  %621 = vmatprep.subr.mxu1 %v773_v0 }
  0x6c   :  { %377 = vmatpush1.msra.mxu0 %v301_v15  ;;  %622 = vmatpush3.msra.mxu1 %v312_v26 }
  0x6d   :  { %378 = vmatprep.subr.mxu0 %v299_v16  ;;  %623 = vmatprep.subr.mxu1 %v773_v0 }
  0x6e   :  { %379 = vmatpush1.msra.mxu0 %v298_v18  ;;  %624 = vmatpush3.msra.mxu1 %v309_v29 }
  0x6f   :  { %380 = vmatprep.subr.mxu0 %v296_v19  ;;  %625 = vmatprep.subr.mxu1 %v773_v0 }
  0x70   :  { %381 = vmatpush1.msra.mxu0 %v295_v21  ;;  %637 = vmatprep.mubr.msk.f32.mxu1 %vm774_vm0, %v773_v0 }
  0x71   :  { %382 = vmatprep.subr.mxu0 %v293_v22  ;;  %626 = vmatpush3.msra.mxu1 %v306_v30 }
  0x72   :  { %383 = vmatpush1.msra.mxu0 %v292_v24  ;;  %627 = vmatprep.subr.mxu1 %v773_v0 }
  0x73   :  { %384 = vmatprep.subr.mxu0 %v290_v25  ;;  %628 = vmatpush3.msra.mxu1 %v303_v31 }
  0x74   :  { %385 = vmatpush1.msra.mxu0 %v289_v27  ;;  %629 = vmatprep.subr.mxu1 %v773_v0 }
  0x75   :  { %419 = vmatmul.mubr.f32.vlgmr.msra.gmra.mxu0 %v851_v28  ;;  %630 = vmatpush3.msra.mxu1 %v300_v32 }
  0x76   :  { %631 = vmatprep.subr.mxu1 %v773_v0 }
  0x77   :  { %632 = vmatpush3.msra.mxu1 %v297_v33 }
  0x78   :  { %633 = vmatprep.subr.mxu1 %v773_v0 }
  0x79   :  { %634 = vmatpush3.msra.mxu1 %v294_v34 }
  0x7a   :  { %635 = vmatprep.subr.mxu1 %v773_v0 }
  0x7b   :  { %636 = vmatpush3.msra.mxu1 %v291_v35 }
  0x7c   :  { %638 = vmatmul.mubr.f32.vlgmr.msra.gmra.mxu1 %v851_v28 }
 0x115   :  { %v214_v42 = vpop.f32.mrf.mxu0 }
 0x116   :  { %v215_v47 = vadd.f32 %v214_v42, %v136_v44 }
 0x117   :  { %v216_v0 = vpop.f32.mrf.mxu0 }
 0x118   :  { %v217_v56 = vadd.f32 %v216_v0, %v140_v54 }
 0x11b   :  { %v285_v36 = vpop.f32.mrf.mxu1 }
 0x11c   :  { %v286_v6 = vadd.f32 %v285_v36, %v144_v2 }
 0x11d   :  { %v604_v37 = vpop.f32.mrf.mxu1 }
 0x135   :  { %v420_v46 = vpop.f32.mrf.mxu0 }
 0x136   :  { %v421_v48 = vadd.f32 %v420_v46, %v342_v45 }
 0x137   :  { %v422_v53 = vpop.f32.mrf.mxu0 }
 0x138   :  { %v495_v49 = vadd.f32 %v421_v48, %v215_v47  ;;  %v423_v55 = vadd.f32 %v422_v53, %v346_v52 }
 0x13a   :  { %v534_v51 = vmul.f32 -1.442695, %v495_v49  ;;  %v502_v58 = vadd.f32 %v423_v55, %v217_v56 }
 0x13c   :  { %649 = vpow2.f32 %v534_v51  ;;  %v491_v57 = vpop.f32.mrf.mxu1  ;;  %v535_v60 = vmul.f32 -1.442695, %v502_v58 }
 0x13d   :  { %v492_v3 = vadd.f32 %v491_v57, %v350_v1 }
 0x13e   :  { %v639_v59 = vpop.f32.mrf.mxu1  ;;  %651 = vpow2.f32 %v535_v60 }
 0x149   :  { %v650_v61 = vpop.eup %649 }
 0x14a   :  { %v499_v62 = vadd.f32 1.0, %v650_v61 }
 0x14b   :  { %v652_v4 = vpop.eup %651 }
 0x14c   :  { %653 = vrcp.f32 %v499_v62  ;;  %v506_v8 = vadd.f32 1.0, %v652_v4 }
 0x159   :  { %v654_v5 = vpop.eup %653 }
 0x15a   :  { %v509_v7 = vmul.f32 %v654_v5, %v492_v3 }
 0x15c   :  { %v510_v9 = vadd.f32 %v509_v7, %v286_v6 }
 0x15e   :  { %655 = vtanh.f32 %v510_v9 }
 0x15f   :  { %657 = vrcp.f32 %v506_v8 }
 0x16b   :  { %v656_v10 = vpop.eup %655 }
 0x16c   :  { %v512_v11 = vsub.f32 %v851_v28, %v656_v10  ;;  %v658_v12 = vpop.eup %657 }
 0x16e   :  { %v513_v13 = vmul.f32 %v658_v12, %v512_v11 }
 0x170   :  { %v514_v14 = vadd.f32 %v656_v10, %v513_v13 }
 0x172   :  { %516 = vst [vmem:[#allocation11] sm:$0xff] %v514_v14 }
 0x173   :  { %750 = shalt.err (!%p747_p10)
}
 0x174   :  { %526 = dma.vmem_to_hbm [thread:$0]  %s524_s5, 128, %s881_s6, [#allocation5]  }
 0x175   :  { %765 = dma.done.wait [#allocation5], 128  }
 0x176   :  { %766 = vsyncadd [#allocation5], 4294967168 }
 0x177   :  { %530 = vsyncpa [#allocation4], 1 }
 0x178   :  { %531 = vsyncpa [#allocation7], 1 }
 0x179   :  { %532 = vsyncpa [#allocation10], 1 }
 0x17a   :  { %533 = vsyncpa [#allocation5], 1 }

</bundles_post_ra>
